<compile_context>
chip_gen: v6e
topology: v6e:2x2x1
jax: 0.10.0
libtpu: 0.0.40
codegen_flags: <defaults>
</compile_context>

<pallas_src>
import jax
import jax.numpy as jnp
from jax.experimental import pallas as pl
from jax.experimental.pallas import tpu as pltpu

_HBM = pltpu.MemorySpace.HBM


def _row_chunks(b, max_chunks=4):
    """Split B rows into up to `max_chunks` contiguous, 8-row-aligned pieces."""
    if b < 16:
        return [(0, b)]
    n = min(max_chunks, b // 8)
    base = (b // n) // 8 * 8  # multiple of 8 sublanes -> tile-aligned DMAs
    chunks, start = [], 0
    for i in range(n):
        size = base if i < n - 1 else b - start
        chunks.append((start, size))
        start += size
    return chunks


def _make_hbm_broadcast_kernel(world, chunks):
    """world==2 path: direct HBM->HBM DMAs; rank 0's slot is aliased (untouched)."""

    def kernel(x_hbm, out_hbm, sems):
        copies = []
        i = 0
        for r in range(1, world):
            for (s, n) in chunks:
                copies.append(
                    pltpu.make_async_copy(
                        x_hbm.at[0, pl.ds(s, n)],
                        out_hbm.at[r, pl.ds(s, n)],
                        sems.at[i],
                    )
                )
                i += 1
        # Start every descriptor before waiting on any -> all DMAs in flight.
        for c in copies:
            c.start()
        for c in copies:
            c.wait()

    return kernel, (world - 1) * len(chunks)


def _vmem_fanout_kernel(x_ref, o_ref):
    # Source chunk is VMEM-resident (same input block across the rank axis);
    # each grid step only streams it back out to one destination rank's slot.
    o_ref[...] = x_ref[...]


def _broadcast_pallas_impl(x_all):
    world, b, d = x_all.shape
    itemsize = jnp.dtype(x_all.dtype).itemsize
    slice_bytes = b * d * itemsize

    if world == 2:
        chunks = _row_chunks(b)
        kernel, n_copies = _make_hbm_broadcast_kernel(world, chunks)
        return pl.pallas_call(
            kernel,
            out_shape=jax.ShapeDtypeStruct(x_all.shape, x_all.dtype),
            in_specs=[pl.BlockSpec(memory_space=_HBM)],
            out_specs=pl.BlockSpec(memory_space=_HBM),
            scratch_shapes=[pltpu.SemaphoreType.DMA((n_copies,))],
            input_output_aliases={0: 0},
            cost_estimate=pl.CostEstimate(
                flops=0, transcendentals=0, bytes_accessed=2 * slice_bytes
            ),
        )(x_all)

    # world > 2: stage rank 0's data through VMEM once per chunk and fan it
    # out to ranks 1..W-1 (HBM traffic W*S instead of 2*(W-1)*S).
    row_bytes = d * itemsize
    max_chunk_bytes = 8 * 1024 * 1024  # v7x: 64 MiB VMEM -> keep peak ~32 MiB
    if b * row_bytes <= max_chunk_bytes or b < 16:
        tb = b
    else:
        tb = max(8, min(b, (max_chunk_bytes // row_bytes) // 8 * 8))
    n_chunks = pl.cdiv(b, tb)
    block_bytes = tb * row_bytes
    vmem_limit = max(16 * 1024 * 1024, 4 * block_bytes + 2 * 1024 * 1024)

    return pl.pallas_call(
        _vmem_fanout_kernel,
        out_shape=jax.ShapeDtypeStruct(x_all.shape, x_all.dtype),
        grid=(n_chunks, world - 1),
        in_specs=[pl.BlockSpec((1, tb, d), lambda c, r: (0, c, 0))],
        out_specs=pl.BlockSpec((1, tb, d), lambda c, r: (r + 1, c, 0)),
        input_output_aliases={0: 0},
        compiler_params=pltpu.CompilerParams(
            dimension_semantics=("parallel", "arbitrary"),
            vmem_limit_bytes=vmem_limit,
        ),
        cost_estimate=pl.CostEstimate(
            flops=0, transcendentals=0, bytes_accessed=world * slice_bytes
        ),
    )(x_all)


# Donate the input so input_output_aliases actually aliases (no defensive copy).
_broadcast_pallas = jax.jit(_broadcast_pallas_impl, donate_argnums=0)


def sync_in_wrapper(x_all, *, min_kernel_bytes=256 * 1024):
    """Pallas implementation of SyncInWrapper.forward.

    Args:
      x_all: [world_size, batch, features] — per-rank local tensors stacked.
        NOTE: the buffer is donated (broadcast happens in place); do not reuse
        x_all after this call other than via the returned handle.
      min_kernel_bytes: per-rank slices smaller than this skip the Pallas
        kernel and use an XLA-native broadcast (launch latency dominates).

    Returns:
      Tuple of one array where every rank's slice equals rank 0's slice.
    """
    assert x_all.ndim == 3, "expected [world, batch, features]"
    world, b, d = x_all.shape
    if world == 1:
        return (x_all,)  # broadcast from src=0 with a single rank is identity
    slice_bytes = b * d * jnp.dtype(x_all.dtype).itemsize
    if slice_bytes < min_kernel_bytes:
        return (jnp.broadcast_to(x_all[0:1], x_all.shape),)
    return (_broadcast_pallas(x_all),)


if __name__ == "__main__":
    key = jax.random.PRNGKey(0)
    k1, k2 = jax.random.split(key)

    # Case 1: world_size=2 -> HBM->HBM DMA path (4 overlapped 8-row sub-DMAs).
    x2 = jax.random.normal(k1, (2, 32, 128), dtype=jnp.float32)
    ref2 = jax.block_until_ready(jnp.broadcast_to(x2[0:1], x2.shape))
    (y2,) = sync_in_wrapper(x2, min_kernel_bytes=0)
    y2 = jax.block_until_ready(y2)
    assert y2.shape == ref2.shape and y2.dtype == ref2.dtype
    assert jnp.array_equal(y2, ref2), "world=2 broadcast mismatch"

    # Case 2: world_size=4 -> VMEM-staged fan-out (source read once per chunk).
    x4 = jax.random.normal(k2, (4, 16, 128), dtype=jnp.float32)
    ref4 = jax.block_until_ready(jnp.broadcast_to(x4[0:1], x4.shape))
    (y4,) = sync_in_wrapper(x4, min_kernel_bytes=0)
    y4 = jax.block_until_ready(y4)
    assert y4.shape == ref4.shape and y4.dtype == ref4.dtype
    assert jnp.array_equal(y4, ref4), "world=4 broadcast mismatch"

    # Case 3: tiny-tensor fast path (default threshold) -> XLA-native broadcast.
    x_small = jax.random.normal(key, (2, 8, 128), dtype=jnp.float32)
    ref_s = jax.block_until_ready(jnp.broadcast_to(x_small[0:1], x_small.shape))
    (y_s,) = sync_in_wrapper(x_small)
    assert jnp.array_equal(jax.block_until_ready(y_s), ref_s), "fast path mismatch"

    print("KERNEL_OK")
</pallas_src>

<mosaic_0001>
module attributes {stable_mosaic.version = 11 : i64} {
  func.func @kernel(%arg0: memref<2x32x128xf32, #tpu.memory_space<hbm>>, %arg1: memref<2x32x128xf32, #tpu.memory_space<hbm>>, %arg2: memref<4x!tpu.dma_semaphore, #tpu.memory_space<semaphore_mem>>) attributes {dimension_semantics = [], scalar_prefetch = 0 : i64, scratch_operands = 1 : i64, tpu.core_type = #tpu.core_type<tc>} {
    %c0_i32 = arith.constant 0 : i32
    %c1_i32 = arith.constant 1 : i32
    %c0_i32_0 = arith.constant 0 : i32
    %c0_i32_1 = arith.constant 0 : i32
    %c0_i32_2 = arith.constant 0 : i32
    %0 = tpu.memref_slice %arg0[%c0_i32, %c0_i32_1, %c0_i32_2] : memref<2x32x128xf32, #tpu.memory_space<hbm>> -> memref<1x8x128xf32, #tpu.memory_space<hbm>>
    %1 = tpu.memref_squeeze %0 : memref<1x8x128xf32, #tpu.memory_space<hbm>> -> memref<8x128xf32, #tpu.memory_space<hbm>>
    %c0_i32_3 = arith.constant 0 : i32
    %c0_i32_4 = arith.constant 0 : i32
    %2 = tpu.memref_slice %arg1[%c1_i32, %c0_i32_3, %c0_i32_4] : memref<2x32x128xf32, #tpu.memory_space<hbm>> -> memref<1x8x128xf32, #tpu.memory_space<hbm>>
    %3 = tpu.memref_squeeze %2 : memref<1x8x128xf32, #tpu.memory_space<hbm>> -> memref<8x128xf32, #tpu.memory_space<hbm>>
    %4 = tpu.memref_slice %arg2[%c0_i32_0] : memref<4x!tpu.dma_semaphore, #tpu.memory_space<semaphore_mem>> -> memref<1x!tpu.dma_semaphore, #tpu.memory_space<semaphore_mem>>
    %5 = tpu.memref_squeeze %4 : memref<1x!tpu.dma_semaphore, #tpu.memory_space<semaphore_mem>> -> memref<!tpu.dma_semaphore, #tpu.memory_space<semaphore_mem>>
    tpu.enqueue_dma source(%1 : memref<8x128xf32, #tpu.memory_space<hbm>>) target(%3 : memref<8x128xf32, #tpu.memory_space<hbm>>) target_semaphore(%5 : memref<!tpu.dma_semaphore, #tpu.memory_space<semaphore_mem>>)
    %c0_i32_5 = arith.constant 0 : i32
    %c1_i32_6 = arith.constant 1 : i32
    %c1_i32_7 = arith.constant 1 : i32
    %c8_i32 = arith.constant 8 : i32
    %c0_i32_8 = arith.constant 0 : i32
    %6 = tpu.memref_slice %arg0[%c0_i32_5, %c8_i32, %c0_i32_8] : memref<2x32x128xf32, #tpu.memory_space<hbm>> -> memref<1x8x128xf32, #tpu.memory_space<hbm>>
    %7 = tpu.memref_squeeze %6 : memref<1x8x128xf32, #tpu.memory_space<hbm>> -> memref<8x128xf32, #tpu.memory_space<hbm>>
    %c8_i32_9 = arith.constant 8 : i32
    %c0_i32_10 = arith.constant 0 : i32
    %8 = tpu.memref_slice %arg1[%c1_i32_6, %c8_i32_9, %c0_i32_10] : memref<2x32x128xf32, #tpu.memory_space<hbm>> -> memref<1x8x128xf32, #tpu.memory_space<hbm>>
    %9 = tpu.memref_squeeze %8 : memref<1x8x128xf32, #tpu.memory_space<hbm>> -> memref<8x128xf32, #tpu.memory_space<hbm>>
    %10 = tpu.memref_slice %arg2[%c1_i32_7] : memref<4x!tpu.dma_semaphore, #tpu.memory_space<semaphore_mem>> -> memref<1x!tpu.dma_semaphore, #tpu.memory_space<semaphore_mem>>
    %11 = tpu.memref_squeeze %10 : memref<1x!tpu.dma_semaphore, #tpu.memory_space<semaphore_mem>> -> memref<!tpu.dma_semaphore, #tpu.memory_space<semaphore_mem>>
    tpu.enqueue_dma source(%7 : memref<8x128xf32, #tpu.memory_space<hbm>>) target(%9 : memref<8x128xf32, #tpu.memory_space<hbm>>) target_semaphore(%11 : memref<!tpu.dma_semaphore, #tpu.memory_space<semaphore_mem>>)
    %c0_i32_11 = arith.constant 0 : i32
    %c1_i32_12 = arith.constant 1 : i32
    %c2_i32 = arith.constant 2 : i32
    %c16_i32 = arith.constant 16 : i32
    %c0_i32_13 = arith.constant 0 : i32
    %12 = tpu.memref_slice %arg0[%c0_i32_11, %c16_i32, %c0_i32_13] : memref<2x32x128xf32, #tpu.memory_space<hbm>> -> memref<1x8x128xf32, #tpu.memory_space<hbm>>
    %13 = tpu.memref_squeeze %12 : memref<1x8x128xf32, #tpu.memory_space<hbm>> -> memref<8x128xf32, #tpu.memory_space<hbm>>
    %c16_i32_14 = arith.constant 16 : i32
    %c0_i32_15 = arith.constant 0 : i32
    %14 = tpu.memref_slice %arg1[%c1_i32_12, %c16_i32_14, %c0_i32_15] : memref<2x32x128xf32, #tpu.memory_space<hbm>> -> memref<1x8x128xf32, #tpu.memory_space<hbm>>
    %15 = tpu.memref_squeeze %14 : memref<1x8x128xf32, #tpu.memory_space<hbm>> -> memref<8x128xf32, #tpu.memory_space<hbm>>
    %16 = tpu.memref_slice %arg2[%c2_i32] : memref<4x!tpu.dma_semaphore, #tpu.memory_space<semaphore_mem>> -> memref<1x!tpu.dma_semaphore, #tpu.memory_space<semaphore_mem>>
    %17 = tpu.memref_squeeze %16 : memref<1x!tpu.dma_semaphore, #tpu.memory_space<semaphore_mem>> -> memref<!tpu.dma_semaphore, #tpu.memory_space<semaphore_mem>>
    tpu.enqueue_dma source(%13 : memref<8x128xf32, #tpu.memory_space<hbm>>) target(%15 : memref<8x128xf32, #tpu.memory_space<hbm>>) target_semaphore(%17 : memref<!tpu.dma_semaphore, #tpu.memory_space<semaphore_mem>>)
    %c0_i32_16 = arith.constant 0 : i32
    %c1_i32_17 = arith.constant 1 : i32
    %c3_i32 = arith.constant 3 : i32
    %c24_i32 = arith.constant 24 : i32
    %c0_i32_18 = arith.constant 0 : i32
    %18 = tpu.memref_slice %arg0[%c0_i32_16, %c24_i32, %c0_i32_18] : memref<2x32x128xf32, #tpu.memory_space<hbm>> -> memref<1x8x128xf32, #tpu.memory_space<hbm>>
    %19 = tpu.memref_squeeze %18 : memref<1x8x128xf32, #tpu.memory_space<hbm>> -> memref<8x128xf32, #tpu.memory_space<hbm>>
    %c24_i32_19 = arith.constant 24 : i32
    %c0_i32_20 = arith.constant 0 : i32
    %20 = tpu.memref_slice %arg1[%c1_i32_17, %c24_i32_19, %c0_i32_20] : memref<2x32x128xf32, #tpu.memory_space<hbm>> -> memref<1x8x128xf32, #tpu.memory_space<hbm>>
    %21 = tpu.memref_squeeze %20 : memref<1x8x128xf32, #tpu.memory_space<hbm>> -> memref<8x128xf32, #tpu.memory_space<hbm>>
    %22 = tpu.memref_slice %arg2[%c3_i32] : memref<4x!tpu.dma_semaphore, #tpu.memory_space<semaphore_mem>> -> memref<1x!tpu.dma_semaphore, #tpu.memory_space<semaphore_mem>>
    %23 = tpu.memref_squeeze %22 : memref<1x!tpu.dma_semaphore, #tpu.memory_space<semaphore_mem>> -> memref<!tpu.dma_semaphore, #tpu.memory_space<semaphore_mem>>
    tpu.enqueue_dma source(%19 : memref<8x128xf32, #tpu.memory_space<hbm>>) target(%21 : memref<8x128xf32, #tpu.memory_space<hbm>>) target_semaphore(%23 : memref<!tpu.dma_semaphore, #tpu.memory_space<semaphore_mem>>)
    %c0_i32_21 = arith.constant 0 : i32
    %c1_i32_22 = arith.constant 1 : i32
    %c0_i32_23 = arith.constant 0 : i32
    %c0_i32_24 = arith.constant 0 : i32
    %c0_i32_25 = arith.constant 0 : i32
    %24 = tpu.memref_slice %arg0[%c0_i32_21, %c0_i32_24, %c0_i32_25] : memref<2x32x128xf32, #tpu.memory_space<hbm>> -> memref<1x8x128xf32, #tpu.memory_space<hbm>>
    %25 = tpu.memref_squeeze %24 : memref<1x8x128xf32, #tpu.memory_space<hbm>> -> memref<8x128xf32, #tpu.memory_space<hbm>>
    %c0_i32_26 = arith.constant 0 : i32
    %c0_i32_27 = arith.constant 0 : i32
    %26 = tpu.memref_slice %arg1[%c1_i32_22, %c0_i32_26, %c0_i32_27] : memref<2x32x128xf32, #tpu.memory_space<hbm>> -> memref<1x8x128xf32, #tpu.memory_space<hbm>>
    %27 = tpu.memref_squeeze %26 : memref<1x8x128xf32, #tpu.memory_space<hbm>> -> memref<8x128xf32, #tpu.memory_space<hbm>>
    %28 = tpu.memref_slice %arg2[%c0_i32_23] : memref<4x!tpu.dma_semaphore, #tpu.memory_space<semaphore_mem>> -> memref<1x!tpu.dma_semaphore, #tpu.memory_space<semaphore_mem>>
    %29 = tpu.memref_squeeze %28 : memref<1x!tpu.dma_semaphore, #tpu.memory_space<semaphore_mem>> -> memref<!tpu.dma_semaphore, #tpu.memory_space<semaphore_mem>>
    tpu.wait_dma2 semaphore(%29 : memref<!tpu.dma_semaphore, #tpu.memory_space<semaphore_mem>>) src(%25 : memref<8x128xf32, #tpu.memory_space<hbm>>) dst(%27 : memref<8x128xf32, #tpu.memory_space<hbm>>)
    %c0_i32_28 = arith.constant 0 : i32
    %c1_i32_29 = arith.constant 1 : i32
    %c1_i32_30 = arith.constant 1 : i32
    %c8_i32_31 = arith.constant 8 : i32
    %c0_i32_32 = arith.constant 0 : i32
    %30 = tpu.memref_slice %arg0[%c0_i32_28, %c8_i32_31, %c0_i32_32] : memref<2x32x128xf32, #tpu.memory_space<hbm>> -> memref<1x8x128xf32, #tpu.memory_space<hbm>>
    %31 = tpu.memref_squeeze %30 : memref<1x8x128xf32, #tpu.memory_space<hbm>> -> memref<8x128xf32, #tpu.memory_space<hbm>>
    %c8_i32_33 = arith.constant 8 : i32
    %c0_i32_34 = arith.constant 0 : i32
    %32 = tpu.memref_slice %arg1[%c1_i32_29, %c8_i32_33, %c0_i32_34] : memref<2x32x128xf32, #tpu.memory_space<hbm>> -> memref<1x8x128xf32, #tpu.memory_space<hbm>>
    %33 = tpu.memref_squeeze %32 : memref<1x8x128xf32, #tpu.memory_space<hbm>> -> memref<8x128xf32, #tpu.memory_space<hbm>>
    %34 = tpu.memref_slice %arg2[%c1_i32_30] : memref<4x!tpu.dma_semaphore, #tpu.memory_space<semaphore_mem>> -> memref<1x!tpu.dma_semaphore, #tpu.memory_space<semaphore_mem>>
    %35 = tpu.memref_squeeze %34 : memref<1x!tpu.dma_semaphore, #tpu.memory_space<semaphore_mem>> -> memref<!tpu.dma_semaphore, #tpu.memory_space<semaphore_mem>>
    tpu.wait_dma2 semaphore(%35 : memref<!tpu.dma_semaphore, #tpu.memory_space<semaphore_mem>>) src(%31 : memref<8x128xf32, #tpu.memory_space<hbm>>) dst(%33 : memref<8x128xf32, #tpu.memory_space<hbm>>)
    %c0_i32_35 = arith.constant 0 : i32
    %c1_i32_36 = arith.constant 1 : i32
    %c2_i32_37 = arith.constant 2 : i32
    %c16_i32_38 = arith.constant 16 : i32
    %c0_i32_39 = arith.constant 0 : i32
    %36 = tpu.memref_slice %arg0[%c0_i32_35, %c16_i32_38, %c0_i32_39] : memref<2x32x128xf32, #tpu.memory_space<hbm>> -> memref<1x8x128xf32, #tpu.memory_space<hbm>>
    %37 = tpu.memref_squeeze %36 : memref<1x8x128xf32, #tpu.memory_space<hbm>> -> memref<8x128xf32, #tpu.memory_space<hbm>>
    %c16_i32_40 = arith.constant 16 : i32
    %c0_i32_41 = arith.constant 0 : i32
    %38 = tpu.memref_slice %arg1[%c1_i32_36, %c16_i32_40, %c0_i32_41] : memref<2x32x128xf32, #tpu.memory_space<hbm>> -> memref<1x8x128xf32, #tpu.memory_space<hbm>>
    %39 = tpu.memref_squeeze %38 : memref<1x8x128xf32, #tpu.memory_space<hbm>> -> memref<8x128xf32, #tpu.memory_space<hbm>>
    %40 = tpu.memref_slice %arg2[%c2_i32_37] : memref<4x!tpu.dma_semaphore, #tpu.memory_space<semaphore_mem>> -> memref<1x!tpu.dma_semaphore, #tpu.memory_space<semaphore_mem>>
    %41 = tpu.memref_squeeze %40 : memref<1x!tpu.dma_semaphore, #tpu.memory_space<semaphore_mem>> -> memref<!tpu.dma_semaphore, #tpu.memory_space<semaphore_mem>>
    tpu.wait_dma2 semaphore(%41 : memref<!tpu.dma_semaphore, #tpu.memory_space<semaphore_mem>>) src(%37 : memref<8x128xf32, #tpu.memory_space<hbm>>) dst(%39 : memref<8x128xf32, #tpu.memory_space<hbm>>)
    %c0_i32_42 = arith.constant 0 : i32
    %c1_i32_43 = arith.constant 1 : i32
    %c3_i32_44 = arith.constant 3 : i32
    %c24_i32_45 = arith.constant 24 : i32
    %c0_i32_46 = arith.constant 0 : i32
    %42 = tpu.memref_slice %arg0[%c0_i32_42, %c24_i32_45, %c0_i32_46] : memref<2x32x128xf32, #tpu.memory_space<hbm>> -> memref<1x8x128xf32, #tpu.memory_space<hbm>>
    %43 = tpu.memref_squeeze %42 : memref<1x8x128xf32, #tpu.memory_space<hbm>> -> memref<8x128xf32, #tpu.memory_space<hbm>>
    %c24_i32_47 = arith.constant 24 : i32
    %c0_i32_48 = arith.constant 0 : i32
    %44 = tpu.memref_slice %arg1[%c1_i32_43, %c24_i32_47, %c0_i32_48] : memref<2x32x128xf32, #tpu.memory_space<hbm>> -> memref<1x8x128xf32, #tpu.memory_space<hbm>>
    %45 = tpu.memref_squeeze %44 : memref<1x8x128xf32, #tpu.memory_space<hbm>> -> memref<8x128xf32, #tpu.memory_space<hbm>>
    %46 = tpu.memref_slice %arg2[%c3_i32_44] : memref<4x!tpu.dma_semaphore, #tpu.memory_space<semaphore_mem>> -> memref<1x!tpu.dma_semaphore, #tpu.memory_space<semaphore_mem>>
    %47 = tpu.memref_squeeze %46 : memref<1x!tpu.dma_semaphore, #tpu.memory_space<semaphore_mem>> -> memref<!tpu.dma_semaphore, #tpu.memory_space<semaphore_mem>>
    tpu.wait_dma2 semaphore(%47 : memref<!tpu.dma_semaphore, #tpu.memory_space<semaphore_mem>>) src(%43 : memref<8x128xf32, #tpu.memory_space<hbm>>) dst(%45 : memref<8x128xf32, #tpu.memory_space<hbm>>)
    return
  }
}

</mosaic_0001>

<bundles_post_ra>
// kernel: _broadcast_pallas_impl.1
= control target key start
LH: loop header
LB: loop body
LE: loop exit
PB: predicated region body
PF: predicated region fallthrough
CT: control target
= control target key end

     0   :  { %s98_s9 = smov [#allocation2]   ;;  %s99_s10 = smov 131072   ;;  %s138_s0 = inlined_call_operand.hbm [shape: f32[2,32,128], index: 0, kind: input, shape index: {}, may-alias: {0,1}]   ;;  %s139_s1 = inlined_call_operand.hbm [shape: f32[2,32,128], index: 1, kind: output, shape index: {}, may-alias: {0,1}]  }
   0x1   :  { %s6_s8 = scalar_lea.hbm %s139_s1, 512  ;;  %s100_s11 = smov 0  }
   0x2   :  { %13 = dma.general %s138_s0, 128, %s6_s8, %s98_s9, %s99_s10, [#allocation4], %s100_s11, 0  }
   0x3   :  { %s14_s16 = scalar_lea.hbm %s138_s0, 128  ;;  %s15_s19 = scalar_lea.hbm %s139_s1, 640 }
   0x4   :  { %s24_s22 = scalar_lea.hbm %s138_s0, 256  ;;  %s101_s23 = smov [#allocation2 + $0x1]  }
   0x5   :  { %23 = dma.general %s14_s16, 128, %s15_s19, %s101_s23, %s99_s10, [#allocation6], %s100_s11, 0  }
   0x6   :  { %s25_s26 = scalar_lea.hbm %s139_s1, 768  ;;  %s102_s27 = smov [#allocation2 + $0x2]  }
   0x7   :  { %33 = dma.general %s24_s22, 128, %s25_s26, %s102_s27, %s99_s10, [#allocation8], %s100_s11, 0  }
   0x8   :  { %s34_s30 = scalar_lea.hbm %s138_s0, 384  ;;  %s35_s4 = scalar_lea.hbm %s139_s1, 896 }
   0x9   :  { %s103_s5 = smov [#allocation2 + $0x3]  }
   0xa   :  { %43 = dma.general %s34_s30, 128, %s35_s4, %s103_s5, %s99_s10, [#allocation10], %s100_s11, 0  }
   0xb   :  { %90 = dma.done.wait [#allocation2], 128 }
   0xc   :  { %91 = vsyncadd [#allocation2], 4294967168 }
   0xd   :  { %92 = dma.done.wait [#allocation2 + $0x1], 128 }
   0xe   :  { %93 = vsyncadd [#allocation2 + $0x1], 4294967168 }
   0xf   :  { %94 = dma.done.wait [#allocation2 + $0x2], 128 }
  0x10   :  { %95 = vsyncadd [#allocation2 + $0x2], 4294967168 }
  0x11   :  { %96 = dma.done.wait [#allocation2 + $0x3], 128 }
  0x12   :  { %97 = vsyncadd [#allocation2 + $0x3], 4294967168 }
  0x13   :  { %53 = vsyncmov [#allocation2] }
  0x16   :  { %s54_s6 = vpop.sfrf %53 }
  0x17   :  { %p80_p0 = scmp.ne.s32.totalorder %s54_s6, 0 }
  0x19   :  { %58 = shalt.err (%p80_p0)  }
  0x1a   :  { %60 = vsyncmov [#allocation2 + $0x1] }
  0x1d   :  { %s61_s0 = vpop.sfrf %60 }
  0x1e   :  { %p81_p1 = scmp.ne.s32.totalorder %s61_s0, 0 }
  0x20   :  { %65 = shalt.err (%p81_p1)  }
  0x21   :  { %67 = vsyncmov [#allocation2 + $0x2] }
  0x24   :  { %s68_s1 = vpop.sfrf %67 }
  0x25   :  { %p82_p2 = scmp.ne.s32.totalorder %s68_s1, 0 }
  0x27   :  { %72 = shalt.err (%p82_p2)  }
  0x28   :  { %74 = vsyncmov [#allocation2 + $0x3] }
  0x2b   :  { %s75_s7 = vpop.sfrf %74 }
  0x2c   :  { %p83_p3 = scmp.ne.s32.totalorder %s75_s7, 0 }
  0x2e   :  { %79 = shalt.err (%p83_p3)  }

</bundles_post_ra>
